<compile_context>
chip_gen: v7x
topology: tpu7x:2x2x1
jax: 0.10.0
libtpu: 0.0.40
codegen_flags: <defaults>
</compile_context>

<pallas_src>
import functools

import numpy as np
import jax
import jax.numpy as jnp
from jax import lax
from jax.experimental import pallas as pl
from jax.experimental.pallas import tpu as pltpu


def _vmem_limit_bytes():
    """Generation-aware scoped-VMEM budget (v5e/v6e: 128 MiB physical, v7x: 64 MiB)."""
    cap = 64 * 1024 * 1024                      # conservative default (v7x per-core)
    try:
        info = pltpu.get_tpu_info()
        c = getattr(info, "vmem_capacity_bytes", None)
        if isinstance(c, (int, np.integer)) and int(c) > 0:
            cap = int(c)
    except Exception:
        pass
    return int(max(32 * 1024 * 1024, min(cap * 3 // 4, 100 * 1024 * 1024)))


def _erf(x):
    # Abramowitz & Stegun 7.1.26 (max abs err ~1.5e-7): exact-GELU erf built from
    # exp / mul / add.  The divide goes through the (otherwise idle) EUP reciprocal.
    a1, a2, a3, a4, a5 = 0.254829592, -0.284496736, 1.421413741, -1.453152027, 1.061405429
    p = 0.3275911
    pos = x >= 0.0
    z = jnp.where(pos, x, -x)
    t = pl.reciprocal(1.0 + p * z, approx=True)
    poly = ((((a5 * t + a4) * t + a3) * t + a2) * t + a1) * t
    y = 1.0 - poly * jnp.exp(-z * z)
    return jnp.where(pos, y, -y)


def _gelu_exact(x):
    return 0.5 * x * (1.0 + _erf(x * 0.7071067811865476))


# ---------------------------------------------------------------------------
# Kernel A: fused QKV projection + rotary embedding.
# ---------------------------------------------------------------------------
def _qkv_rope_kernel(embed_dim, num_heads, x_ref, cos_ref, sin_ref, wbig_ref, bbig_ref,
                     q_ref, k_ref, v_ref):
    E = embed_dim
    x = x_ref[0]                                                        # (TS, E) bf16
    # columns: [q*s | (q@R)*s | k | k@R | v]   (R = rotate_half, s = Dh**-0.5)
    proj = jnp.dot(x, wbig_ref[...], preferred_element_type=jnp.float32)
    proj = proj + bbig_ref[...]                                         # (TS, 5E) f32
    # rotary tables are (TS, Dh); broadcast across heads in-kernel (lane tile).
    cos = jnp.tile(cos_ref[0], (1, num_heads)).astype(jnp.float32)      # (TS, E)
    sin = jnp.tile(sin_ref[0], (1, num_heads)).astype(jnp.float32)
    qa, qb = proj[:, 0:E], proj[:, E:2 * E]
    ka, kb = proj[:, 2 * E:3 * E], proj[:, 3 * E:4 * E]
    v = proj[:, 4 * E:5 * E]
    q_ref[0] = (qa * cos + qb * sin).astype(q_ref.dtype)
    k_ref[0] = (ka * cos + kb * sin).astype(k_ref.dtype)
    v_ref[0] = v.astype(v_ref.dtype)


# ---------------------------------------------------------------------------
# Kernel B: attention + fused out_proj + FFN + residual for one (batch, q-tile).
# ---------------------------------------------------------------------------
def _attn_ffn_kernel(num_heads, head_dim, n_valid,
                     x_ref, q_ref, k_ref, v_ref,
                     wout_ref, bout_ref,
                     w1x_ref, w1m_ref, b1_ref, gamma_ref, beta_ref,
                     w2_ref, b2_ref, o_ref, ctx_scr):
    tq = q_ref.shape[1]
    n_keys = k_ref.shape[1]

    # compile-time key-column mask (only materialized when the sequence was padded).
    if n_valid < n_keys:
        col = lax.broadcasted_iota(jnp.int32, (tq, n_keys), 1)
        key_mask = col < n_valid
    else:
        key_mask = None

    # Per-head attention; normalized bf16 context is written into the persistent
    # (TQ, E) scratch so the out_proj below is a single full-width K=E matmul.
    for h in range(num_heads):
        lo = h * head_dim
        qh = q_ref[0, :, lo:lo + head_dim]        # (TQ, Dh) bf16 — ref slice (view)
        kh = k_ref[0, :, lo:lo + head_dim]        # (N,  Dh) bf16
        vh = v_ref[0, :, lo:lo + head_dim]        # (N,  Dh) bf16
        s = lax.dot_general(qh, kh, (((1,), (1,)), ((), ())),
                            preferred_element_type=jnp.float32)          # (TQ, N) f32
        if key_mask is not None:
            s = jnp.where(key_mask, s, -1e30)
        m = jnp.max(s, axis=-1, keepdims=True)
        p = jnp.exp(s - m)
        l = jnp.sum(p, axis=-1, keepdims=True)                           # (TQ, 1)
        ctx = jnp.dot(p.astype(jnp.bfloat16), vh,
                      preferred_element_type=jnp.float32)                # (TQ, Dh)
        ctx = ctx * pl.reciprocal(l, approx=True)    # normalise ctx, not probs
        ctx_scr[:, lo:lo + head_dim] = ctx.astype(ctx_scr.dtype)

    # Fused out_proj: one (TQ,E)@(E,E) MXU matmul over the lane-concatenated heads.
    message = jnp.dot(ctx_scr[...], wout_ref[...],
                      preferred_element_type=jnp.float32) + bout_ref[...]

    # FFN on cat([x, message]) without the concat: W1 split into two halves.
    x = x_ref[0].astype(jnp.float32)
    h1 = (jnp.dot(x.astype(jnp.bfloat16), w1x_ref[...],
                  preferred_element_type=jnp.float32)
          + jnp.dot(message.astype(jnp.bfloat16), w1m_ref[...],
                    preferred_element_type=jnp.float32)
          + b1_ref[...])
    mu = jnp.mean(h1, axis=-1, keepdims=True)
    var = jnp.mean(jnp.square(h1 - mu), axis=-1, keepdims=True)
    hn = (h1 - mu) * lax.rsqrt(var + 1e-5) * gamma_ref[...] + beta_ref[...]
    g = _gelu_exact(hn)
    ffn = jnp.dot(g.astype(jnp.bfloat16), w2_ref[...],
                  preferred_element_type=jnp.float32) + b2_ref[...]
    o_ref[0] = (x + ffn).astype(o_ref.dtype)


def _round_up(n, m):
    return -(-n // m) * m


def self_block_forward(x, encoding, params, num_heads, seq_tile=512, q_tile=256):
    B, N, E = x.shape
    assert E % num_heads == 0
    Dh = E // num_heads
    assert Dh % 2 == 0
    scale = Dh ** -0.5

    # --- sequence padding: tiles never degrade to full-N for large ragged N -------
    if N >= q_tile:
        n_pad = _round_up(N, q_tile)
        tq = q_tile
        ts = seq_tile if (seq_tile <= n_pad and n_pad % seq_tile == 0) else tq
    else:
        n_pad = _round_up(N, 8)
        tq = ts = n_pad
    pad = n_pad - N

    # --- weight prep (compile-time wrapper transforms) ----------------------------
    # PyTorch Wqkv output channels are interleaved as (head, dim, qkv):
    # regroup to contiguous [q | k | v], head-major.
    wqkv = params["wqkv"]                                        # (3E, E)
    bqkv = params["bqkv"]                                        # (3E,)
    wqkv_r = wqkv.reshape(num_heads, Dh, 3, E).transpose(2, 0, 1, 3).reshape(3 * E, E)
    bqkv_r = bqkv.reshape(num_heads, Dh, 3).transpose(2, 0, 1).reshape(3 * E)
    wq, wk, wv = wqkv_r[:E].T, wqkv_r[E:2 * E].T, wqkv_r[2 * E:].T   # (E_in, E_out)
    bq, bk, bv = bqkv_r[:E], bqkv_r[E:2 * E], bqkv_r[2 * E:]

    # rotate_half as a pairwise (E, E) linear map (pairs never cross heads).
    rot_np = np.zeros((E, E), np.float32)
    for i in range(E // 2):
        rot_np[2 * i + 1, 2 * i] = -1.0
        rot_np[2 * i, 2 * i + 1] = 1.0
    R = jnp.asarray(rot_np)

    # Fused projection [q | q@R | k | k@R | v] with the attention scale folded into Q.
    wbig = jnp.concatenate(
        [wq * scale, (wq @ R) * scale, wk, wk @ R, wv], axis=1).astype(jnp.bfloat16)
    bbig = jnp.concatenate(
        [bq * scale, (bq @ R) * scale, bk, bk @ R, bv]).reshape(1, 5 * E).astype(jnp.float32)

    wout = params["wout"].T.astype(jnp.bfloat16)                 # (E, E), un-split
    bout = params["bout"].reshape(1, E).astype(jnp.float32)
    w1t = params["w1"].T                                         # (2E_in, 2E_out)
    w1x = w1t[:E].astype(jnp.bfloat16)
    w1m = w1t[E:].astype(jnp.bfloat16)
    b1 = params["b1"].reshape(1, 2 * E).astype(jnp.float32)
    gamma = params["gamma"].reshape(1, 2 * E).astype(jnp.float32)
    beta = params["beta"].reshape(1, 2 * E).astype(jnp.float32)
    w2 = params["w2"].T.astype(jnp.bfloat16)                     # (2E, E)
    b2 = params["b2"].reshape(1, E).astype(jnp.float32)

    # rotary tables stay head-dim-wide (B, N, Dh) bf16 — broadcast in-kernel.
    cos = encoding[0].reshape(B, N, Dh).astype(jnp.bfloat16)
    sin = encoding[1].reshape(B, N, Dh).astype(jnp.bfloat16)

    x_bf16 = x.astype(jnp.bfloat16)                              # kernel A input
    if pad:
        x = jnp.pad(x, ((0, 0), (0, pad), (0, 0)))
        x_bf16 = jnp.pad(x_bf16, ((0, 0), (0, pad), (0, 0)))
        cos = jnp.pad(cos, ((0, 0), (0, pad), (0, 0)))
        sin = jnp.pad(sin, ((0, 0), (0, pad), (0, 0)))

    cparams = pltpu.CompilerParams(
        dimension_semantics=("parallel", "parallel"),
        vmem_limit_bytes=_vmem_limit_bytes())

    def full_spec(shape):
        # Grid-invariant (weight) block.  Note: could be single-buffered via
        # pipeline_mode=pl.Buffered(1) to save VMEM on v7x.
        return pl.BlockSpec(shape, lambda b, i, _n=len(shape): (0,) * _n)

    # ---- kernel A: QKV projection + rotary ---------------------------------------
    def a_spec(d):
        return pl.BlockSpec((1, ts, d), lambda b, i: (b, i, 0))

    cost_a = pl.CostEstimate(
        flops=int(2 * B * n_pad * E * 5 * E + 8 * B * n_pad * E),
        transcendentals=0,
        bytes_accessed=int(B * n_pad * E * 2 + 2 * B * n_pad * Dh * 2
                           + E * 5 * E * 2 + 5 * E * 4 + 3 * B * n_pad * E * 2))

    q_rot, k_rot, v = pl.pallas_call(
        functools.partial(_qkv_rope_kernel, E, num_heads),
        grid=(B, n_pad // ts),
        in_specs=[a_spec(E), a_spec(Dh), a_spec(Dh),
                  full_spec((E, 5 * E)), full_spec((1, 5 * E))],
        out_specs=(a_spec(E), a_spec(E), a_spec(E)),
        out_shape=tuple(jax.ShapeDtypeStruct((B, n_pad, E), jnp.bfloat16) for _ in range(3)),
        compiler_params=cparams,
        cost_estimate=cost_a,
    )(x_bf16, cos, sin, wbig, bbig)

    # ---- kernel B: attention + fused out_proj + FFN + residual --------------------
    def b_spec(d):
        return pl.BlockSpec((1, tq, d), lambda b, i: (b, i, 0))

    kv_spec = pl.BlockSpec((1, n_pad, E), lambda b, i: (b, 0, 0))

    cost_b = pl.CostEstimate(
        flops=int(B * (4 * n_pad * n_pad * E            # QK^T + P@V (all heads)
                       + 2 * n_pad * E * E              # fused out_proj
                       + 8 * n_pad * E * E              # W1 (x + message halves)
                       + 4 * n_pad * E * E)             # W2
                  + 40 * B * n_pad * E),
        transcendentals=int(B * (n_pad * n_pad + 6 * n_pad * E)),
        bytes_accessed=int(2 * B * n_pad * E * 4 + 3 * B * n_pad * E * 2
                           + (E * E + 4 * E * E + 2 * E * E) * 2))

    out = pl.pallas_call(
        functools.partial(_attn_ffn_kernel, num_heads, Dh, N),
        grid=(B, n_pad // tq),
        in_specs=[b_spec(E),                     # x tile (residual + FFN input, f32)
                  b_spec(E),                     # q_rot tile
                  kv_spec, kv_spec,              # k_rot / v, full (padded) sequence
                  full_spec((E, E)),             # Wout^T (un-split, one K=E matmul)
                  full_spec((1, E)),             # bout
                  full_spec((E, 2 * E)),         # W1 (x half)
                  full_spec((E, 2 * E)),         # W1 (message half)
                  full_spec((1, 2 * E)),         # b1
                  full_spec((1, 2 * E)),         # LN gamma
                  full_spec((1, 2 * E)),         # LN beta
                  full_spec((2 * E, E)),         # W2
                  full_spec((1, E))],            # b2
        out_specs=b_spec(E),
        out_shape=jax.ShapeDtypeStruct((B, n_pad, E), x.dtype),
        scratch_shapes=[pltpu.VMEM((tq, E), jnp.bfloat16)],   # lane-concat ctx slab
        compiler_params=cparams,
        cost_estimate=cost_b,
    )(x, q_rot, k_rot, v, wout, bout, w1x, w1m, b1, gamma, beta, w2, b2)

    return out[:, :N] if pad else out


if __name__ == "__main__":
    B, N, E, H = 2, 12, 32, 4        # N=12 exercises the padding + key-mask path
    Dh = E // H

    key = jax.random.PRNGKey(0)
    keys = jax.random.split(key, 10)

    def init(k, shape, scale=0.1):
        return scale * jax.random.normal(k, shape, dtype=jnp.float32)

    x = init(keys[0], (B, N, E), scale=1.0)

    # rotary encoding (cos, sin), shape (2, B, 1, N, head_dim)
    theta = jax.random.normal(keys[1], (B, 1, N, Dh), dtype=jnp.float32)
    encoding = jnp.stack([jnp.cos(theta), jnp.sin(theta)], axis=0)

    params = {
        "wqkv": init(keys[2], (3 * E, E)),
        "bqkv": init(keys[3], (3 * E,)),
        "wout": init(keys[4], (E, E)),
        "bout": init(keys[5], (E,)),
        "w1":   init(keys[6], (2 * E, 2 * E)),
        "b1":   init(keys[7], (2 * E,)),
        "gamma": jnp.ones((2 * E,), jnp.float32),
        "beta":  jnp.zeros((2 * E,), jnp.float32),
        "w2":   init(keys[8], (E, 2 * E)),
        "b2":   init(keys[9], (E,)),
    }

    out = self_block_forward(x, encoding, params, H)
    jax.block_until_ready(out)
    assert out.shape == (B, N, E)
    assert bool(jnp.all(jnp.isfinite(out)))
    print("KERNEL_OK")
</pallas_src>

<mosaic_0001>
module attributes {stable_mosaic.version = 11 : i64} {
  func.func @_qkv_rope_kernel(%arg0: i32, %arg1: i32, %arg2: memref<1x16x32xbf16, #tpu.memory_space<vmem>>, %arg3: memref<1x16x8xbf16, #tpu.memory_space<vmem>>, %arg4: memref<1x16x8xbf16, #tpu.memory_space<vmem>>, %arg5: memref<32x160xbf16, #tpu.memory_space<vmem>>, %arg6: memref<1x160xf32, #tpu.memory_space<vmem>>, %arg7: memref<1x16x32xbf16, #tpu.memory_space<vmem>>, %arg8: memref<1x16x32xbf16, #tpu.memory_space<vmem>>, %arg9: memref<1x16x32xbf16, #tpu.memory_space<vmem>>) attributes {dimension_semantics = [#tpu.dimension_semantics<parallel>, #tpu.dimension_semantics<parallel>], iteration_bounds = array<i64: 2, 1>, scalar_prefetch = 0 : i64, scratch_operands = 0 : i64, tpu.core_type = #tpu.core_type<tc>, window_params = [{transform_indices = @transform_0, window_bounds = array<i64: 1, 16, 32>}, {transform_indices = @transform_1, window_bounds = array<i64: 1, 16, 8>}, {transform_indices = @transform_2, window_bounds = array<i64: 1, 16, 8>}, {pipeline_mode = #tpu.pipeline_mode<synchronous>, transform_indices = @transform_3, window_bounds = array<i64: 32, 160>}, {pipeline_mode = #tpu.pipeline_mode<synchronous>, transform_indices = @transform_4, window_bounds = array<i64: 1, 160>}, {transform_indices = @transform_5, window_bounds = array<i64: 1, 16, 32>}, {transform_indices = @transform_6, window_bounds = array<i64: 1, 16, 32>}, {transform_indices = @transform_7, window_bounds = array<i64: 1, 16, 32>}]} {
    %c0 = arith.constant 0 : index
    %c0_0 = arith.constant 0 : index
    %c0_1 = arith.constant 0 : index
    %0 = vector.load %arg2[%c0, %c0_0, %c0_1] : memref<1x16x32xbf16, #tpu.memory_space<vmem>>, vector<1x16x32xbf16>
    %1 = vector.shape_cast %0 : vector<1x16x32xbf16> to vector<16x32xbf16>
    %c0_2 = arith.constant 0 : index
    %c0_3 = arith.constant 0 : index
    %2 = vector.load %arg5[%c0_2, %c0_3] : memref<32x160xbf16, #tpu.memory_space<vmem>>, vector<32x160xbf16>
    %cst = arith.constant dense<0.000000e+00> : vector<16x160xf32>
    %3 = tpu.matmul %1, %2, %cst {dimension_numbers = #tpu.dot_dimension_numbers<[1], [0], [0], [1], [0, 0, 1, 1], [], []>} : vector<16x32xbf16>, vector<32x160xbf16>, vector<16x160xf32> -> vector<16x160xf32>
    %c0_4 = arith.constant 0 : index
    %c0_5 = arith.constant 0 : index
    %4 = vector.load %arg6[%c0_4, %c0_5] : memref<1x160xf32, #tpu.memory_space<vmem>>, vector<1x160xf32>
    %5 = vector.broadcast %4 : vector<1x160xf32> to vector<16x160xf32>
    %6 = arith.addf %3, %5 : vector<16x160xf32>
    %c0_6 = arith.constant 0 : index
    %c0_7 = arith.constant 0 : index
    %c0_8 = arith.constant 0 : index
    %7 = vector.load %arg3[%c0_6, %c0_7, %c0_8] : memref<1x16x8xbf16, #tpu.memory_space<vmem>>, vector<1x16x8xbf16>
    %8 = vector.shape_cast %7 : vector<1x16x8xbf16> to vector<16x8xbf16>
    %9 = tpu.concatenate %8, %8, %8, %8 in 1 : vector<16x8xbf16>, vector<16x8xbf16>, vector<16x8xbf16>, vector<16x8xbf16> -> vector<16x32xbf16>
    %10 = arith.extf %9 : vector<16x32xbf16> to vector<16x32xf32>
    %c0_9 = arith.constant 0 : index
    %c0_10 = arith.constant 0 : index
    %c0_11 = arith.constant 0 : index
    %11 = vector.load %arg4[%c0_9, %c0_10, %c0_11] : memref<1x16x8xbf16, #tpu.memory_space<vmem>>, vector<1x16x8xbf16>
    %12 = vector.shape_cast %11 : vector<1x16x8xbf16> to vector<16x8xbf16>
    %13 = tpu.concatenate %12, %12, %12, %12 in 1 : vector<16x8xbf16>, vector<16x8xbf16>, vector<16x8xbf16>, vector<16x8xbf16> -> vector<16x32xbf16>
    %14 = arith.extf %13 : vector<16x32xbf16> to vector<16x32xf32>
    %15 = vector.extract_strided_slice %6 {offsets = [0, 0], sizes = [16, 32], strides = [1, 1]} : vector<16x160xf32> to vector<16x32xf32>
    %16 = vector.extract_strided_slice %6 {offsets = [0, 32], sizes = [16, 32], strides = [1, 1]} : vector<16x160xf32> to vector<16x32xf32>
    %17 = vector.extract_strided_slice %6 {offsets = [0, 64], sizes = [16, 32], strides = [1, 1]} : vector<16x160xf32> to vector<16x32xf32>
    %18 = vector.extract_strided_slice %6 {offsets = [0, 96], sizes = [16, 32], strides = [1, 1]} : vector<16x160xf32> to vector<16x32xf32>
    %19 = vector.extract_strided_slice %6 {offsets = [0, 128], sizes = [16, 32], strides = [1, 1]} : vector<16x160xf32> to vector<16x32xf32>
    %20 = arith.mulf %15, %10 : vector<16x32xf32>
    %21 = arith.mulf %16, %14 : vector<16x32xf32>
    %22 = arith.addf %20, %21 : vector<16x32xf32>
    %23 = arith.truncf %22 : vector<16x32xf32> to vector<16x32xbf16>
    %c0_12 = arith.constant 0 : index
    %c0_13 = arith.constant 0 : index
    %c0_14 = arith.constant 0 : index
    %24 = vector.load %arg7[%c0_12, %c0_13, %c0_14] : memref<1x16x32xbf16, #tpu.memory_space<vmem>>, vector<1x16x32xbf16>
    %25 = vector.shape_cast %24 : vector<1x16x32xbf16> to vector<16x32xbf16>
    %26 = vector.shape_cast %23 : vector<16x32xbf16> to vector<1x16x32xbf16>
    tpu.vector_store %arg7[%c0_12, %c0_13, %c0_14], %26 {strides = array<i32>} : memref<1x16x32xbf16, #tpu.memory_space<vmem>>, vector<1x16x32xbf16>,
    %27 = arith.mulf %17, %10 : vector<16x32xf32>
    %28 = arith.mulf %18, %14 : vector<16x32xf32>
    %29 = arith.addf %27, %28 : vector<16x32xf32>
    %30 = arith.truncf %29 : vector<16x32xf32> to vector<16x32xbf16>
    %c0_15 = arith.constant 0 : index
    %c0_16 = arith.constant 0 : index
    %c0_17 = arith.constant 0 : index
    %31 = vector.load %arg8[%c0_15, %c0_16, %c0_17] : memref<1x16x32xbf16, #tpu.memory_space<vmem>>, vector<1x16x32xbf16>
    %32 = vector.shape_cast %31 : vector<1x16x32xbf16> to vector<16x32xbf16>
    %33 = vector.shape_cast %30 : vector<16x32xbf16> to vector<1x16x32xbf16>
    tpu.vector_store %arg8[%c0_15, %c0_16, %c0_17], %33 {strides = array<i32>} : memref<1x16x32xbf16, #tpu.memory_space<vmem>>, vector<1x16x32xbf16>,
    %34 = arith.truncf %19 : vector<16x32xf32> to vector<16x32xbf16>
    %c0_18 = arith.constant 0 : index
    %c0_19 = arith.constant 0 : index
    %c0_20 = arith.constant 0 : index
    %35 = vector.load %arg9[%c0_18, %c0_19, %c0_20] : memref<1x16x32xbf16, #tpu.memory_space<vmem>>, vector<1x16x32xbf16>
    %36 = vector.shape_cast %35 : vector<1x16x32xbf16> to vector<16x32xbf16>
    %37 = vector.shape_cast %34 : vector<16x32xbf16> to vector<1x16x32xbf16>
    tpu.vector_store %arg9[%c0_18, %c0_19, %c0_20], %37 {strides = array<i32>} : memref<1x16x32xbf16, #tpu.memory_space<vmem>>, vector<1x16x32xbf16>,
    return
  }
  func.func @transform_0(%arg0: i32, %arg1: i32) -> (i32, i32, i32) {
    %c0_i32 = arith.constant 0 : i32
    %c0_i32_0 = arith.constant 0 : i32
    return %arg0, %arg1, %c0_i32 : i32, i32, i32
  }
  func.func @transform_1(%arg0: i32, %arg1: i32) -> (i32, i32, i32) {
    %c0_i32 = arith.constant 0 : i32
    %c0_i32_0 = arith.constant 0 : i32
    return %arg0, %arg1, %c0_i32 : i32, i32, i32
  }
  func.func @transform_2(%arg0: i32, %arg1: i32) -> (i32, i32, i32) {
    %c0_i32 = arith.constant 0 : i32
    %c0_i32_0 = arith.constant 0 : i32
    return %arg0, %arg1, %c0_i32 : i32, i32, i32
  }
  func.func @transform_3(%arg0: i32, %arg1: i32) -> (i32, i32) {
    %c0_i32 = arith.constant 0 : i32
    %c0_i32_0 = arith.constant 0 : i32
    %c0_i32_1 = arith.constant 0 : i32
    return %c0_i32, %c0_i32_0 : i32, i32
  }
  func.func @transform_4(%arg0: i32, %arg1: i32) -> (i32, i32) {
    %c0_i32 = arith.constant 0 : i32
    %c0_i32_0 = arith.constant 0 : i32
    %c0_i32_1 = arith.constant 0 : i32
    return %c0_i32, %c0_i32_0 : i32, i32
  }
  func.func @transform_5(%arg0: i32, %arg1: i32) -> (i32, i32, i32) {
    %c0_i32 = arith.constant 0 : i32
    %c0_i32_0 = arith.constant 0 : i32
    return %arg0, %arg1, %c0_i32 : i32, i32, i32
  }
  func.func @transform_6(%arg0: i32, %arg1: i32) -> (i32, i32, i32) {
    %c0_i32 = arith.constant 0 : i32
    %c0_i32_0 = arith.constant 0 : i32
    return %arg0, %arg1, %c0_i32 : i32, i32, i32
  }
  func.func @transform_7(%arg0: i32, %arg1: i32) -> (i32, i32, i32) {
    %c0_i32 = arith.constant 0 : i32
    %c0_i32_0 = arith.constant 0 : i32
    return %arg0, %arg1, %c0_i32 : i32, i32, i32
  }
}

</mosaic_0001>

<bundles_post_ra>
// kernel: tpu_custom_call.1
= control target key start
LH: loop header
LB: loop body
LE: loop exit
PB: predicated region body
PF: predicated region fallthrough
CT: control target
= control target key end

     0   :  { %s1461_s0 = inlined_call_operand.vmem [shape: bf16[2,16,32], index: 0, kind: input, shape index: {}]   ;;  %s1462_s1 = inlined_call_operand.vmem [shape: bf16[2,16,8], index: 1, kind: input, shape index: {}]   ;;  %s1463_s2 = inlined_call_operand.vmem [shape: bf16[2,16,8], index: 2, kind: input, shape index: {}]   ;;  %s1464_s3 = inlined_call_operand.vmem [shape: bf16[32,160], index: 3, kind: input, shape index: {}]   ;;  %s1465_s4 = inlined_call_operand.vmem [shape: f32[1,160], index: 4, kind: input, shape index: {}]   ;;  %s1466_s5 = inlined_call_operand.hbm [shape: bf16[2,16,32], index: 5, kind: output, shape index: {0}]   ;;  %s1467_s6 = inlined_call_operand.hbm [shape: bf16[2,16,32], index: 6, kind: output, shape index: {1}]   ;;  %s1468_s7 = inlined_call_operand.hbm [shape: bf16[2,16,32], index: 7, kind: output, shape index: {2}]  }
   0x1   :  { %1473 = sst [smem:[#allocation9_spill]] %s1461_s0 }
   0x2   :  { %1474 = sst [smem:[#allocation10_spill]] %s1462_s1 }
   0x3   :  { %13 = vsyncpa [#allocation3], 0 }
   0x4   :  { %15 = vsyncpa [#allocation3 + $0x1], 0 }
   0x5   :  { %16 = vsyncpa [#allocation5], 0 }
   0x6   :  { %18 = vsyncpa [#allocation5 + $0x1], 0  ;;  %s1212_s24 = smov 0   ;;  %s1214_s25 = smov 0  }
   0x7   :  { %s1216_s26 = smov 0   ;;  %s1218_s27 = smov 0  }
   0x8   :  { %s1220_s28 = smov 0   ;;  %s1222_s29 = smov 0  }
   0x9 LB: > { %s1470_s30 = sadd.s32 4294967295, %s1159_s29   ;;  %s1469_s8 = sadd.s32 4294967294, %s1159_s29   ;;  %s1159_s29 = sphi %s1222_s29, %s24_s29   ;;  %s1155_s28 = sphi %s1220_s28, %s1486_s28   ;;  %s1151_s27 = sphi %s1218_s27, %s1485_s27   ;;  %s1147_s26 = sphi %s1216_s26, %s1484_s26   ;;  %s1143_s25 = sphi %s1214_s25, %s1483_s25   ;;  %s1139_s24 = sphi %s1212_s24, %s1482_s24  }
   0xa   : > { %s36_s9 = sadd.s32 1, %s1155_s28  ;;  %s171_s10 = sadd.s32 1, %s1147_s26 }
   0xb   : > { %p38_p0 = scmp.ge.s32.totalorder %s36_s9, 2  ;;  %p181_p1 = scmp.ne.s32.totalorder %s1147_s26, %s1143_s25 }
   0xc   : > { %p182_p2 = scmp.eq.s32.totalorder %s1470_s30, 1  ;;  %p187_p3 = scmp.ne.s32.totalorder %s1143_s25, %s1139_s24 }
   0xd   : > { %s1488_s9 = smov (%p38_p0, %s36_s9), 0  ;;  %p188_p5 = scmp.eq.s32.totalorder %s1469_s8, 1 }
   0xe   : > { %p1254_p4 = por %p182_p2, %p181_p1  ;;  %s166_s12 = ssub.s32 %s1155_s28, %s1488_s9 }
   0xf   : > { %p877_p6 = scmp.ge.s32.totalorder %s1159_s29, 1  ;;  %p169_p7 = scmp.eq.s32.totalorder %s166_s12, 0 }
  0x10   : > { %p1263_p8 = por %p188_p5, %p187_p3  ;;  %p307_p9 = scmp.lt.s32.totalorder %s1159_s29, 3 }
  0x11   : > { %s1269_s14 = scalar_select %p169_p7, %s1147_s26, %s171_s10  }
  0x12   : > { %p308_p10 = pnand %p877_p6, %p307_p9 }
  0x13   : > { %p372_p11 = scmp.lt.s32.totalorder (!%p308_p10), %s1151_s27, 1  ;;  %v1014_v0 = vld [vmem:[%s1464_s3 + $0x4] ss:$8 sps:$4 sm:$0xff] (!%p308_p10)   ;;  %v1016_v1 = vld [vmem:[%s1464_s3] ss:$8 sps:$4 sm:$0xff] (!%p308_p10)   ;;  %v1161_v4 = vmov (!%p308_p10), 0   ;;  %v413_v26 = vlaneseq (!%p308_p10) }
  0x14   : > { %311 = sbr.rel (%p308_p10) target bundleno = 546 (0x222), region = 40  ;;  %452 = vmatprep.subr.bf16.mxu0 (!%p308_p10), %v1014_v0  ;;  %v1017_v2 = vld [vmem:[%s1464_s3 + $0x14] ss:$8 sps:$4 sm:$0xff] (!%p308_p10)   ;;  %v1019_v3 = vld [vmem:[%s1464_s3 + $0x10] ss:$8 sps:$4 sm:$0xff] (!%p308_p10)   ;;  %484 = vmatprep.mubr.bf16.mxu0 (!%p308_p10), %v1161_v4  ;;  %s1477_s1 = sld [smem:[#allocation10_spill]] (!%p308_p10) }
  0x15   : > { %453 = vmatpush1.bf16.msra.mxu0 (!%p308_p10), %v1016_v1  ;;  %s1478_s0 = sld [smem:[#allocation9_spill]] (!%p308_p10)  ;;  %s1162_s22 = smov (!%p308_p10), 8   ;;  %vm448_vm0 = vcmask (!%p308_p10), 261120   ;;  %vm508_vm1 = vcmask (!%p308_p10), 64512   ;;  %vm512_vm2 = vcmask (!%p308_p10), 130048   ;;  %vm515_vm3 = vcmask (!%p308_p10), 195584  }
  0x16   : > { %454 = vmatprep.subr.bf16.mxu0 (!%p308_p10), %v1017_v2  ;;  %s1163_s23 = smov (!%p308_p10), 24   ;;  %v414_v27 = vshrl.u32 (!%p308_p10), %v413_v26, 7  ;;  %v411_v29 = vld [vmem:[%s1465_s4] sm:$0x3] (!%p308_p10)  ;;  %vm574_vm4 = vcmask (!%p308_p10), 257024   ;;  %s1168_s12 = smov (!%p308_p10), [#allocation2]  }
  0x17   : > { %s1025_s15 = sshll.u32 (!%p308_p10), %s1168_s12, 4  ;;  %s1026_s15 = int_to_ptr.vmem [resolvable:$false] %s1025_s15 }
  0x18   : > { %v419_v28 = vsub.s32 (!%p308_p10), 1, %v414_v27  ;;  %v415_v39 = vsub.s32 (!%p308_p10), 0, %v414_v27 }
  0x19   : > { %455 = vmatpush1.bf16.msra.mxu0 (!%p308_p10), %v1019_v3 }
  0x1a   : > { %v420_v30 = vrot.slane (!%p308_p10), %v411_v29, %v419_v28  ;;  %v416_v40 = vrot.slane (!%p308_p10), %v411_v29, %v415_v39 }
  0x1b   : > { %s373_s19 = scalar_select %p372_p11, %s1151_s27, 1 }
  0x1d   : > { %s912_s10 = sshll.u32 %s373_s19, 3  ;;  %s1164_s19 = smov 16  }
  0x1e   : > { %s399_s16 = scalar_lea.vmem %s1463_s2, %s912_s10  ;;  %s389_s8 = scalar_lea.vmem %s1477_s1, %s912_s10 }
  0x1f   : > { %v1012_v5 = vld [vmem:[%s399_s16] sm:$0xff]   ;;  %s379_s30 = scalar_lea.vmem %s1478_s0, %s912_s10  ;;  %s1471_s10 = smov 64  }
  0x20   : > { %v1013_v6 = vld [vmem:[%s389_s8] sm:$0xff]   ;;  %528 = vrot.lane.b32.xlu0 %v1012_v5, %s1162_s22  ;;  %532 = vrot.lane.b32.xlu1 %v1012_v5, %s1163_s23  ;;  %s1166_s8 = smov 32   ;;  %s354_s16 = sand.u32 1, %s1143_s25  }
  0x21   : > { %v1020_v7 = vld [vmem:[%s379_s30] sm:$0xff]   ;;  %s1165_s30 = smov 96   ;;  %s1302_s17 = sshll.u32 %s354_s16, 3 }
  0x22   : > { %892 = vmatmul.mubr.msk.bf16.vlgmr.msra.gmra.mrb[0].mxu0 %vm448_vm0, %v1020_v7  ;;  %s1305_s18 = scalar_lea.vmem [#allocation6], %s1302_s17  ;;  %s356_s20 = scalar_lea.vmem [#allocation2], %s1302_s17 }
  0x23   : > { %s655_s21 = sshll.u32 %s356_s20, 4  ;;  %s1321_s21 = int_to_ptr.vmem [resolvable:$true] %s655_s21 }
  0x24   : > { %530 = vrot.lane.b32.xlu0 %v1012_v5, %s1164_s19  ;;  %502 = vrot.lane.b32.xlu1 %v1013_v6, %s1162_s22  ;;  %s1317_s22 = sshll.u32 %s1151_s27, 7  ;;  %s1333_s27 = scalar_lea.sflag [#allocation3], %s354_s16 }
  0x25   : > { %p1028_p1 = scmp.lt.s32.totalorder %s1321_s21, %s1026_s15 }
  0x28   : > { %504 = vrot.lane.b32.xlu0 %v1013_v6, %s1164_s19  ;;  %506 = vrot.lane.b32.xlu1 %v1013_v6, %s1163_s23 }
  0x92   : > { %v529_v8 = vpop.permute.xlu0 %528  ;;  %v533_v9 = vpop.permute.xlu1 %532 }
  0x93   : > { %v536_v10 = vsel %vm508_vm1, %v1012_v5, %v529_v8 }
  0x96   : > { %v531_v11 = vpop.permute.xlu0 %530  ;;  %v503_v12 = vpop.permute.xlu1 %502 }
  0x97   : > { %v538_v13 = vsel %vm512_vm2, %v536_v10, %v531_v11  ;;  %v511_v15 = vsel %vm508_vm1, %v1013_v6, %v503_v12 }
  0x98   : > { %v540_v14 = vsel %vm515_vm3, %v538_v13, %v533_v9 }
  0x99   : > { %v542_v16 = vunpack.c.l.bf16 %v540_v14  ;;  %v543_v17 = vunpack.c.h.bf16 %v540_v14 }
  0x9a   : > { %v505_v18 = vpop.permute.xlu0 %504  ;;  %v507_v19 = vpop.permute.xlu1 %506 }
  0x9b   : > { %v514_v20 = vsel %vm512_vm2, %v511_v15, %v505_v18  ;;  %v997_v21 = vpack.i.bf16 %v543_v17, %v542_v16 }
  0x9c   : > { %v517_v22 = vsel %vm515_vm3, %v514_v20, %v507_v19 }
  0x9d   : > { %v519_v23 = vunpack.c.l.bf16 %v517_v22  ;;  %v520_v24 = vunpack.c.h.bf16 %v517_v22  ;;  %998 = vrot.lane.b32.xlu0 %v997_v21, %s1165_s30 }
  0x9f   : > { %v1002_v25 = vpack.i.bf16 %v520_v24, %v519_v23 }
  0xa1   : > { %1008 = vrot.lane.b32.xlu0 %v997_v21, %s1166_s8  ;;  %1003 = vrot.lane.b32.xlu1 %v1002_v25, %s1471_s10  ;;  %s1021_s8 = scalar_lea.vmem %s1321_s21, 128 }
  0xa2   : > { %p1022_p12 = scmp.ne.s32.totalorder %s1321_s21, %s1021_s8 }
  0xa4   : > { %p1023_p13 = pnand %p1022_p12, %p1254_p4 }
  0xa6   : > { %p1024_p0 = pneg %p1023_p13 }
  0xf5   : > { %v486_v31 = vpop.f32.mrb[0].mxu0 }
  0xf6   : > { %v488_v32 = vpop.f32.mrb[1].mxu0  ;;  %v487_v42 = vadd.f32 %v486_v31, %v416_v40 }
  0xf7   : > { %v489_v33 = vadd.f32 %v488_v32, %v420_v30  ;;  %v490_v34 = vpop.f32.mrb[2].mxu0 }
  0xf8   : > { %v492_v35 = vpop.f32.mrb[3].mxu0  ;;  %v491_v43 = vadd.f32 %v490_v34, %v416_v40  ;;  %v544_v1 = vmul.f32 %v519_v23, %v487_v42 }
  0xf9   : > { %v919_v36 = vpack.c.bf16 %v489_v33, %v489_v33  ;;  %v493_v37 = vadd.f32 %v492_v35, %v420_v30 }
  0xfa   : > { %v545_v0 = vmul.f32 %v520_v24, %v491_v43 }
  0xfb   : > { %627 = vst.msk [vmem:[%s1305_s18] sm:$0xf] %vm574_vm4, %v919_v36  ;;  %v920_v38 = vpack.c.bf16 %v493_v37, %v493_v37 }
  0xfd   : > { %628 = vst.msk [vmem:[%s1305_s18 + $0x4] sm:$0xf] %vm574_vm4, %v920_v38 }
 0x10f   : > { %v999_v41 = vpop.permute.xlu0 %998 }
 0x110   : > { %v1001_v44 = vunpack.i.h.bf16 %v999_v41  ;;  %v1000_v45 = vunpack.i.l.bf16 %v999_v41 }
 0x112   : > { %v593_v46 = vmul.f32 %v1000_v45, %v487_v42  ;;  %v594_v47 = vmul.f32 %v1001_v44, %v491_v43 }
 0x113   : > { %v1009_v48 = vpop.permute.xlu0 %1008  ;;  %v1004_v53 = vpop.permute.xlu1 %1003 }
 0x114   : > { %v1011_v49 = vunpack.i.h.bf16 %v1009_v48  ;;  %v1010_v50 = vunpack.i.l.bf16 %v1009_v48  ;;  %599 = vrot.lane.b32.xlu0 %v594_v47, %s1165_s30  ;;  %597 = vrot.lane.b32.xlu1 %v593_v46, %s1165_s30  ;;  %v1006_v54 = vunpack.i.h.bf16 %v1004_v53  ;;  %v1005_v55 = vunpack.i.l.bf16 %v1004_v53 }
 0x116   : > { %v554_v51 = vmul.f32 %v1010_v50, %v487_v42  ;;  %v555_v52 = vmul.f32 %v1011_v49, %v491_v43  ;;  %v586_v56 = vmul.f32 %v1006_v54, %v491_v43  ;;  %v585_v57 = vmul.f32 %v1005_v55, %v487_v42 }
 0x118   : > { %560 = vrot.lane.b32.xlu0 %v555_v52, %s1165_s30  ;;  %558 = vrot.lane.b32.xlu1 %v554_v51, %s1165_s30  ;;  %s1327_s30 = scalar_lea.hbm %s1466_s5, %s1317_s22 }
 0x186   : > { %v600_v58 = vpop.permute.xlu0 %599  ;;  %v598_v59 = vpop.permute.xlu1 %597 }
 0x187   : > { %v604_v60 = vadd.f32 %v600_v58, %v586_v56  ;;  %v603_v61 = vadd.f32 %v598_v59, %v585_v57 }
 0x189   : > { %v918_v62 = vpack.c.bf16 %v604_v60, %v604_v60  ;;  %v917_v63 = vpack.c.bf16 %v603_v61, %v603_v61 }
 0x18a   : > { %v561_v2 = vpop.permute.xlu0 %560  ;;  %v559_v3 = vpop.permute.xlu1 %558 }
 0x18b   : > { %v565_v4 = vadd.f32 %v561_v2, %v545_v0  ;;  %v564_v5 = vadd.f32 %v559_v3, %v544_v1  ;;  %613 = vrot.lane.b32.xlu0 %v918_v62, %s1471_s10  ;;  %611 = vrot.lane.b32.xlu1 %v917_v63, %s1471_s10  ;;  %s1027_s10 = scalar_lea.vmem %s1026_s15, 256 }
 0x18c   : > { %p1029_p2 = scmp.lt.s32.totalorder %s1027_s10, %s1021_s8 }
 0x18d   : > { %v916_v6 = vpack.c.bf16 %v565_v4, %v565_v4  ;;  %v915_v7 = vpack.c.bf16 %v564_v5, %v564_v5 }
 0x18e   : > { %p1030_p3 = por %p1029_p2, %p1028_p1 }
 0x18f   : > { %576 = vst.msk [vmem:[%s356_s20 + $0x4] sm:$0xf] %vm574_vm4, %v916_v6  ;;  %575 = vst.msk [vmem:[%s356_s20] sm:$0xf] %vm574_vm4, %v915_v7 }
 0x190   : > { %p1031_p5 = pnand %p1030_p3, %p1024_p0 }
 0x192   : > { %1034 = shalt.err (!%p1031_p5)
}
 0x193   : > { %s1035_s16 = scalar_lea.hbm %s1327_s30, 128  ;;  %s1039_s19 = scalar_lea.hbm %s1466_s5, 256 }
 0x194   : > { %p1036_p6 = scmp.ne.s32.totalorder %s1327_s30, %s1035_s16  ;;  %p1040_p10 = scmp.lt.u32.totalorder %s1327_s30, %s1466_s5 }
 0x195   : > { %p1041_p11 = scmp.lt.u32.totalorder %s1039_s19, %s1035_s16  ;;  %p1043_p13 = scmp.lt.u32.totalorder %s1035_s16, %s1327_s30 }
 0x196   : > { %p1037_p7 = pnand %p1036_p6, %p1254_p4 }
 0x197   : > { %p1042_p12 = por %p1041_p11, %p1040_p10 }
 0x198   : > { %p1038_p9 = pneg %p1037_p7 }
 0x199   : > { %p1044_p0 = por %p1043_p13, %p1042_p12 }
 0x19b   : > { %p1045_p1 = pnand %p1044_p0, %p1038_p9 }
 0x19d   : > { %1048 = shalt.err (!%p1045_p1)
}
 0x19e   : > { %s1169_s10 = smov 4   ;;  %s1479_s8 = smov 64  }
 0x19f   : > { %924 = dma.vmem_to_hbm [thread:$0]  (%p1254_p4), %s1321_s21, 128, %s1327_s30, %s1333_s27, %s1479_s8, %s1479_s8, %s1169_s10  }
 0x1a0   : > { %s363_s16 = scalar_lea.vmem [#allocation4], %s1302_s17  ;;  %s1480_s23 = sadd.s32 4294967295, %s1159_s29  }
 0x1a1   : > { %s673_s20 = sshll.u32 %s363_s16, 4  ;;  %s1363_s19 = sand.u32 1, %s1480_s23   ;;  %s1366_s20 = int_to_ptr.vmem [resolvable:$true] %s673_s20 }
 0x1a2   : > { %s691_s12 = sshll.u32 %s1305_s18, 4  ;;  %s1372_s1 = scalar_lea.hbm %s1467_s6, %s1317_s22  ;;  %s1374_s12 = int_to_ptr.vmem [resolvable:$true] %s691_s12 }
 0x1a3   : > { %s1380_s30 = scalar_lea.hbm %s1468_s7, %s1317_s22  ;;  %s635_s18 = scalar_lea.sflag [#allocation5], %s1363_s19 }
 0x1a4   : > { %s1049_s0 = scalar_lea.vmem %s1366_s20, 128  ;;  %s1170_s27 = smov [#allocation4]  }
 0x1a5   : > { %p1050_p2 = scmp.ne.s32.totalorder %s1366_s20, %s1049_s0  ;;  %s1053_s23 = sshll.u32 %s1170_s27, 4  ;;  %s1054_s23 = int_to_ptr.vmem [resolvable:$false] %s1053_s23 }
 0x1a6   : > { %s1055_s15 = scalar_lea.vmem %s1054_s23, 256  ;;  %p1056_p6 = scmp.lt.s32.totalorder %s1366_s20, %s1054_s23 }
 0x1a7   : > { %p1051_p3 = pnand %p1050_p2, %p1254_p4  ;;  %p1057_p7 = scmp.lt.s32.totalorder %s1055_s15, %s1049_s0 }
 0x1a9   : > { %p1052_p5 = pneg %p1051_p3  ;;  %p1058_p9 = por %p1057_p7, %p1056_p6 }
 0x1ab   : > { %p1059_p10 = pnand %p1058_p9, %p1052_p5 }
 0x1fd   : > { %v614_v8 = vpop.permute.xlu0 %613  ;;  %v612_v9 = vpop.permute.xlu1 %611 }
 0x1fe   : > { %618 = vst.msk [vmem:[%s363_s16 + $0x4] sm:$0xf] %vm574_vm4, %v614_v8  ;;  %617 = vst.msk [vmem:[%s363_s16] sm:$0xf] %vm574_vm4, %v612_v9 }
 0x1ff   : > { %1062 = shalt.err (!%p1059_p10)
}
 0x200   : > { %s1063_s22 = scalar_lea.hbm %s1372_s1, 128  ;;  %s1067_s21 = scalar_lea.hbm %s1467_s6, 256 }
 0x201   : > { %p1064_p11 = scmp.ne.s32.totalorder %s1372_s1, %s1063_s22  ;;  %p1068_p0 = scmp.lt.u32.totalorder %s1372_s1, %s1467_s6 }
 0x202   : > { %p1069_p1 = scmp.lt.u32.totalorder %s1067_s21, %s1063_s22  ;;  %p1071_p3 = scmp.lt.u32.totalorder %s1063_s22, %s1372_s1 }
 0x203   : > { %p1065_p12 = pnand %p1064_p11, %p1254_p4 }
 0x204   : > { %p1070_p2 = por %p1069_p1, %p1068_p0 }
 0x205   : > { %p1066_p13 = pneg %p1065_p12 }
 0x206   : > { %p1072_p5 = por %p1071_p3, %p1070_p2 }
 0x208   : > { %p1073_p6 = pnand %p1072_p5, %p1066_p13 }
 0x20a   : > { %1076 = shalt.err (!%p1073_p6)
}
 0x20b   : > { %925 = dma.vmem_to_hbm [thread:$0]  (%p1254_p4), %s1366_s20, 128, %s1372_s1, %s635_s18, %s1479_s8, %s1479_s8, %s1169_s10  }
 0x20c   : > { %s1077_s0 = scalar_lea.vmem %s1374_s12, 128  ;;  %s1171_s15 = smov [#allocation6]  }
 0x20d   : > { %p1078_p7 = scmp.ne.s32.totalorder %s1374_s12, %s1077_s0  ;;  %s1081_s22 = sshll.u32 %s1171_s15, 4  ;;  %s1082_s22 = int_to_ptr.vmem [resolvable:$false] %s1081_s22 }
 0x20e   : > { %s1083_s16 = scalar_lea.vmem %s1082_s22, 256  ;;  %p1084_p11 = scmp.lt.s32.totalorder %s1374_s12, %s1082_s22 }
 0x20f   : > { %p1079_p9 = pnand %p1078_p7, %p1254_p4  ;;  %p1085_p12 = scmp.lt.s32.totalorder %s1083_s16, %s1077_s0 }
 0x211   : > { %p1080_p10 = pneg %p1079_p9  ;;  %p1086_p13 = por %p1085_p12, %p1084_p11 }
 0x213   : > { %p1087_p0 = pnand %p1086_p13, %p1080_p10 }
 0x215   : > { %1090 = shalt.err (!%p1087_p0)
}
 0x216   : > { %s1091_s1 = scalar_lea.hbm %s1380_s30, 128  ;;  %s1095_s21 = scalar_lea.hbm %s1468_s7, 256 }
 0x217   : > { %p1092_p1 = scmp.ne.s32.totalorder %s1380_s30, %s1091_s1  ;;  %p1096_p5 = scmp.lt.u32.totalorder %s1380_s30, %s1468_s7 }
 0x218   : > { %p1097_p6 = scmp.lt.u32.totalorder %s1095_s21, %s1091_s1  ;;  %p1099_p9 = scmp.lt.u32.totalorder %s1091_s1, %s1380_s30 }
 0x219   : > { %p1093_p2 = pnand %p1092_p1, %p1254_p4 }
 0x21a   : > { %p1098_p7 = por %p1097_p6, %p1096_p5 }
 0x21b   : > { %p1094_p3 = pneg %p1093_p2 }
 0x21c   : > { %p1100_p10 = por %p1099_p9, %p1098_p7 }
 0x21e   : > { %p1101_p11 = pnand %p1100_p10, %p1094_p3 }
 0x220   : > { %1104 = shalt.err (!%p1101_p11)
}
 0x221   : > { %926 = dma.vmem_to_hbm [thread:$0]  (%p1254_p4), %s1374_s12, 128, %s1380_s30, %s635_s18, %s1479_s8, %s1479_s8, %s1169_s10  }
 0x222 PF: > { %p940_p12 = scmp.ge.s32.totalorder %s1159_s29, 2  ;;  %s706_s0 = sand.u32 1, %s1139_s24  }
 0x223   : > { %s707_s15 = scalar_lea.sflag [#allocation3], %s706_s0 }
 0x224   : > { %p931_p13 = pnand %p940_p12, %p1263_p8 }
 0x226   : > { %1130 = dma.done.wait (!%p931_p13), %s707_s15, 128  }
 0x227   : > { %1132 = vsyncadd (!%p931_p13), %s707_s15, 4294967168  ;;  %s1481_s11 = sadd.s32 4294967294, %s1159_s29  }
 0x228   : > { %s715_s22 = sand.u32 1, %s1481_s11  }
 0x229   : > { %s716_s16 = scalar_lea.sflag [#allocation5], %s715_s22 }
 0x22a   : > { %1134 = dma.done.wait (!%p931_p13), %s716_s16, 256  }
 0x22b   : > { %1136 = vsyncadd (!%p931_p13), %s716_s16, 4294967040  ;;  %s24_s29 = sadd.s32 1, %s1159_s29   ;;  %s1482_s24 = smov %s1143_s25 }
 0x22c   : > { %p21_p4 = scmp.ge.s32.totalorder %s24_s29, 4   ;;  %s1483_s25 = smov %s1147_s26 }
 0x22d   : > { %s1484_s26 = smov %s1269_s14  ;;  %s1485_s27 = smov %s1155_s28 }
 0x22e   : > { %s1486_s28 = smov %s1488_s9  ;;  %23 = sbr.rel (!%p21_p4) target bundleno = 9 (0x9), region = 113 }
 0x235   :  { %730 = vsyncpa [#allocation3], 1 }
 0x236   :  { %732 = vsyncpa [#allocation3 + $0x1], 1 }
 0x237   :  { %733 = vsyncpa [#allocation5], 1 }
 0x238   :  { %735 = vsyncpa [#allocation5 + $0x1], 1 }

</bundles_post_ra>
